<compile_context>
chip_gen: v7x
topology: tpu7x:2x2x1
jax: 0.10.0
libtpu: 0.0.40
codegen_flags: <defaults>
</compile_context>

<pallas_src>
import jax
import jax.numpy as jnp
from jax.experimental import pallas as pl
from jax.experimental.pallas import tpu as pltpu


def _round_up(n, m):
    return ((n + m - 1) // m) * m


def _valuenet_kernel(x_ref, w1_ref, b1_ref, w2_ref, b2_ref, o_ref):
    """One batch tile, transposed orientation (batch on lanes).

    x_ref : [S, TM]   features for TM batch rows (lane = batch row)
    w1_ref: [H, S]    fc1 weight (PyTorch [out, in] layout), VMEM-resident
    b1_ref: [H, 1]    fc1 bias (column), VMEM-resident
    w2_ref: [H, 1]    fc2 weight (column), VMEM-resident
    b2_ref: [1, 1]    fc2 bias, SMEM scalar
    o_ref : [1, TM]   per-row value estimates, lane-dense
    """
    x = x_ref[...]                                         # [S, TM]
    s = x_ref.shape[0]

    if s <= 16:
        # fc1 as `s` unrolled VPU broadcast-FMAs: [H,1] * [1,TM] -> [H,TM].
        # Keeps the tiny K=s, N=H matmul off the MXU (and its result FIFO).
        h = w1_ref[:, 0:1] * x[0:1, :]
        for k in range(1, s):
            h = h + w1_ref[:, k:k + 1] * x[k:k + 1, :]
    else:
        # Larger feature dims: the MXU is the right tool.
        h = jnp.dot(w1_ref[...], x, preferred_element_type=jnp.float32)

    h = jnp.maximum(h + b1_ref[...], 0.0)                  # ReLU, [H, TM]

    # fc2 (N=1): VPU multiply + sublane reduce instead of a 1-column matmul.
    v = jnp.sum(h * w2_ref[...], axis=0, keepdims=True)    # [1, TM]
    o_ref[...] = v + b2_ref[0, 0]                          # SMEM scalar bias


def value_net_forward(x, w1, b1, w2, b2, *, block_batch=4096):
    """ValueNet forward: relu(x @ w1.T + b1) @ w2 + b2.

    x : [B, S] float32
    w1: [H, S] float32   (PyTorch fc1.weight layout)
    b1: [H, 1] float32
    w2: [H, 1] float32   (fc2.weight stored as a column)
    b2: [1, 1] float32
    returns [B, 1] float32
    """
    B, S = x.shape
    H = w1.shape[0]

    # Lane-dense batch tile (multiple of 128), but never over-pad tiny batches.
    tm = min(block_batch, _round_up(B, 128))
    b_pad = _round_up(B, tm)
    grid = (b_pad // tm,)

    # Transposed orientation: batch on lanes everywhere. The wrapper-side
    # transpose/pad is pure layout plumbing; padded rows are sliced off below.
    x_t = jnp.transpose(x)                                 # [S, B]
    if b_pad != B:
        x_t = jnp.pad(x_t, ((0, 0), (0, b_pad - B)))

    out = pl.pallas_call(
        _valuenet_kernel,
        out_shape=jax.ShapeDtypeStruct((1, b_pad), jnp.float32),
        grid=grid,
        in_specs=[
            pl.BlockSpec((S, tm), lambda i: (0, i)),       # pipelined x tiles
            pl.BlockSpec((H, S), lambda i: (0, 0)),        # resident weights
            pl.BlockSpec((H, 1), lambda i: (0, 0)),
            pl.BlockSpec((H, 1), lambda i: (0, 0)),
            pl.BlockSpec(memory_space=pltpu.MemorySpace.SMEM),  # scalar b2
        ],
        out_specs=pl.BlockSpec((1, tm), lambda i: (0, i)),  # lane-dense output
        compiler_params=pltpu.CompilerParams(
            dimension_semantics=("parallel",),              # megacore on v7x
        ),
    )(x_t, w1, b1, w2, b2)

    return out[0, :B].reshape(B, 1)


def init_value_net_params(key, state_dim, hidden_dim):
    """Deterministic init mirroring torch.nn.Linear default:
    U(-1/sqrt(fan_in), 1/sqrt(fan_in)) for both weight and bias."""
    k1, k2, k3, k4 = jax.random.split(key, 4)
    bound1 = 1.0 / jnp.sqrt(jnp.float32(state_dim))
    bound2 = 1.0 / jnp.sqrt(jnp.float32(hidden_dim))
    # fc1 weight in PyTorch [out, in] layout; biases / fc2 weight as columns.
    w1 = jax.random.uniform(k1, (hidden_dim, state_dim), jnp.float32, -bound1, bound1)
    b1 = jax.random.uniform(k2, (hidden_dim, 1), jnp.float32, -bound1, bound1)
    w2 = jax.random.uniform(k3, (hidden_dim, 1), jnp.float32, -bound2, bound2)
    b2 = jax.random.uniform(k4, (1, 1), jnp.float32, -bound2, bound2)
    return w1, b1, w2, b2


if __name__ == "__main__":
    state_dim = 4
    hidden_dim = 32
    batch = 2

    key = jax.random.PRNGKey(0)
    k_params, k_x = jax.random.split(key)

    w1, b1, w2, b2 = init_value_net_params(k_params, state_dim, hidden_dim)
    x = jax.random.normal(k_x, (batch, state_dim), dtype=jnp.float32)

    out = value_net_forward(x, w1, b1, w2, b2)
    out = jax.block_until_ready(out)

    # Reference check in plain JAX (same math as the PyTorch forward).
    ref = jnp.maximum(x @ w1.T + b1[:, 0], 0.0) @ w2 + b2
    assert out.shape == (batch, 1)
    assert jnp.allclose(out, ref, atol=1e-5, rtol=1e-5)

    print("KERNEL_OK")
</pallas_src>

<mosaic_0001>
module attributes {stable_mosaic.version = 11 : i64} {
  func.func @_valuenet_kernel(%arg0: i32, %arg1: memref<4x128xf32, #tpu.memory_space<vmem>>, %arg2: memref<32x4xf32, #tpu.memory_space<vmem>>, %arg3: memref<32x1xf32, #tpu.memory_space<vmem>>, %arg4: memref<32x1xf32, #tpu.memory_space<vmem>>, %arg5: memref<1x1xf32, #tpu.memory_space<smem>>, %arg6: memref<1x128xf32, #tpu.memory_space<vmem>>) attributes {dimension_semantics = [#tpu.dimension_semantics<parallel>], iteration_bounds = array<i64: 1>, scalar_prefetch = 0 : i64, scratch_operands = 0 : i64, tpu.core_type = #tpu.core_type<tc>, window_params = [{transform_indices = @transform_0, window_bounds = array<i64: 4, 128>}, {pipeline_mode = #tpu.pipeline_mode<synchronous>, transform_indices = @transform_1, window_bounds = array<i64: 32, 4>}, {pipeline_mode = #tpu.pipeline_mode<synchronous>, transform_indices = @transform_2, window_bounds = array<i64: 32, 1>}, {pipeline_mode = #tpu.pipeline_mode<synchronous>, transform_indices = @transform_3, window_bounds = array<i64: 32, 1>}, {transform_indices = @transform_4, window_bounds = array<i64: 1, 1>}, {transform_indices = @transform_5, window_bounds = array<i64: 1, 128>}]} {
    %c0 = arith.constant 0 : index
    %c0_0 = arith.constant 0 : index
    %0 = vector.load %arg1[%c0, %c0_0] : memref<4x128xf32, #tpu.memory_space<vmem>>, vector<4x128xf32>
    %c0_1 = arith.constant 0 : index
    %c0_2 = arith.constant 0 : index
    %1 = vector.load %arg2[%c0_1, %c0_2] : memref<32x4xf32, #tpu.memory_space<vmem>>, vector<32x1xf32>
    %2 = vector.extract_strided_slice %0 {offsets = [0, 0], sizes = [1, 128], strides = [1, 1]} : vector<4x128xf32> to vector<1x128xf32>
    %3 = vector.broadcast %1 : vector<32x1xf32> to vector<32x128xf32>
    %4 = vector.broadcast %2 : vector<1x128xf32> to vector<32x128xf32>
    %5 = arith.mulf %3, %4 : vector<32x128xf32>
    %c0_3 = arith.constant 0 : index
    %c1 = arith.constant 1 : index
    %6 = vector.load %arg2[%c0_3, %c1] : memref<32x4xf32, #tpu.memory_space<vmem>>, vector<32x1xf32>
    %7 = vector.extract_strided_slice %0 {offsets = [1, 0], sizes = [1, 128], strides = [1, 1]} : vector<4x128xf32> to vector<1x128xf32>
    %8 = vector.broadcast %6 : vector<32x1xf32> to vector<32x128xf32>
    %9 = vector.broadcast %7 : vector<1x128xf32> to vector<32x128xf32>
    %10 = arith.mulf %8, %9 : vector<32x128xf32>
    %11 = arith.addf %5, %10 : vector<32x128xf32>
    %c0_4 = arith.constant 0 : index
    %c2 = arith.constant 2 : index
    %12 = vector.load %arg2[%c0_4, %c2] : memref<32x4xf32, #tpu.memory_space<vmem>>, vector<32x1xf32>
    %13 = vector.extract_strided_slice %0 {offsets = [2, 0], sizes = [1, 128], strides = [1, 1]} : vector<4x128xf32> to vector<1x128xf32>
    %14 = vector.broadcast %12 : vector<32x1xf32> to vector<32x128xf32>
    %15 = vector.broadcast %13 : vector<1x128xf32> to vector<32x128xf32>
    %16 = arith.mulf %14, %15 : vector<32x128xf32>
    %17 = arith.addf %11, %16 : vector<32x128xf32>
    %c0_5 = arith.constant 0 : index
    %c3 = arith.constant 3 : index
    %18 = vector.load %arg2[%c0_5, %c3] : memref<32x4xf32, #tpu.memory_space<vmem>>, vector<32x1xf32>
    %19 = vector.extract_strided_slice %0 {offsets = [3, 0], sizes = [1, 128], strides = [1, 1]} : vector<4x128xf32> to vector<1x128xf32>
    %20 = vector.broadcast %18 : vector<32x1xf32> to vector<32x128xf32>
    %21 = vector.broadcast %19 : vector<1x128xf32> to vector<32x128xf32>
    %22 = arith.mulf %20, %21 : vector<32x128xf32>
    %23 = arith.addf %17, %22 : vector<32x128xf32>
    %c0_6 = arith.constant 0 : index
    %c0_7 = arith.constant 0 : index
    %24 = vector.load %arg3[%c0_6, %c0_7] : memref<32x1xf32, #tpu.memory_space<vmem>>, vector<32x1xf32>
    %25 = vector.broadcast %24 : vector<32x1xf32> to vector<32x128xf32>
    %26 = arith.addf %23, %25 : vector<32x128xf32>
    %cst = arith.constant 0.000000e+00 : f32
    %27 = vector.broadcast %cst : f32 to vector<32x128xf32>
    %28 = arith.maximumf %26, %27 : vector<32x128xf32>
    %c0_8 = arith.constant 0 : index
    %c0_9 = arith.constant 0 : index
    %29 = vector.load %arg4[%c0_8, %c0_9] : memref<32x1xf32, #tpu.memory_space<vmem>>, vector<32x1xf32>
    %30 = vector.broadcast %29 : vector<32x1xf32> to vector<32x128xf32>
    %31 = arith.mulf %28, %30 : vector<32x128xf32>
    %cst_10 = arith.constant dense<0.000000e+00> : vector<128xf32>
    %32 = vector.multi_reduction <add>, %31, %cst_10 [0] : vector<32x128xf32> to vector<128xf32>
    %33 = vector.shape_cast %32 : vector<128xf32> to vector<1x128xf32>
    %c0_11 = arith.constant 0 : index
    %c0_12 = arith.constant 0 : index
    %34 = memref.load %arg5[%c0_11, %c0_12] : memref<1x1xf32, #tpu.memory_space<smem>>
    %35 = vector.broadcast %34 : f32 to vector<1x128xf32>
    %36 = arith.addf %33, %35 : vector<1x128xf32>
    %c0_13 = arith.constant 0 : index
    %c0_14 = arith.constant 0 : index
    %37 = vector.load %arg6[%c0_13, %c0_14] : memref<1x128xf32, #tpu.memory_space<vmem>>, vector<1x128xf32>
    tpu.vector_store %arg6[%c0_13, %c0_14], %36 {strides = array<i32>} : memref<1x128xf32, #tpu.memory_space<vmem>>, vector<1x128xf32>,
    return
  }
  func.func @transform_0(%arg0: i32) -> (i32, i32) {
    %c0_i32 = arith.constant 0 : i32
    %c0_i32_0 = arith.constant 0 : i32
    return %c0_i32, %arg0 : i32, i32
  }
  func.func @transform_1(%arg0: i32) -> (i32, i32) {
    %c0_i32 = arith.constant 0 : i32
    %c0_i32_0 = arith.constant 0 : i32
    %c0_i32_1 = arith.constant 0 : i32
    return %c0_i32, %c0_i32_0 : i32, i32
  }
  func.func @transform_2(%arg0: i32) -> (i32, i32) {
    %c0_i32 = arith.constant 0 : i32
    %c0_i32_0 = arith.constant 0 : i32
    %c0_i32_1 = arith.constant 0 : i32
    return %c0_i32, %c0_i32_0 : i32, i32
  }
  func.func @transform_3(%arg0: i32) -> (i32, i32) {
    %c0_i32 = arith.constant 0 : i32
    %c0_i32_0 = arith.constant 0 : i32
    %c0_i32_1 = arith.constant 0 : i32
    return %c0_i32, %c0_i32_0 : i32, i32
  }
  func.func @transform_4(%arg0: i32) -> (i32, i32) {
    %c0_i32 = arith.constant 0 : i32
    %c0_i32_0 = arith.constant 0 : i32
    %c0_i32_1 = arith.constant 0 : i32
    return %c0_i32, %c0_i32_0 : i32, i32
  }
  func.func @transform_5(%arg0: i32) -> (i32, i32) {
    %c0_i32 = arith.constant 0 : i32
    %c0_i32_0 = arith.constant 0 : i32
    return %c0_i32, %arg0 : i32, i32
  }
}

</mosaic_0001>

<bundles_post_ra>
// kernel: tpu_custom_call.1
= control target key start
LH: loop header
LB: loop body
LE: loop exit
PB: predicated region body
PF: predicated region fallthrough
CT: control target
= control target key end

     0   :  { %v267_v1 = vmov 2   ;;  %v268_v2 = vmov 1   ;;  %s356_s0 = inlined_call_operand.vmem [shape: f32[4,128], index: 0, kind: input, shape index: {}]   ;;  %s357_s1 = inlined_call_operand.vmem [shape: f32[32,4], index: 1, kind: input, shape index: {}]   ;;  %s358_s2 = inlined_call_operand.vmem [shape: f32[32,1], index: 2, kind: input, shape index: {}]   ;;  %s359_s3 = inlined_call_operand.vmem [shape: f32[32,1], index: 3, kind: input, shape index: {}]   ;;  %s360_s4 = inlined_call_operand.<no memory space> [shape: f32[1,1], index: 4, kind: input, shape index: {}]   ;;  %s361_s5 = inlined_call_operand.hbm [shape: f32[1,128], index: 5, kind: output, shape index: {}]  }
   0x1   :  { %v23_v0 = vld [vmem:[%s357_s1] sm:$0xff]  ;;  %232 = vset.pattern.permute.xlu0 %v267_v1  ;;  %231 = vset.pattern.permute.xlu1 %v268_v2  ;;  %v24_v3 = vld [vmem:[%s357_s1 + $0x8] sm:$0xff]  ;;  %v26_v4 = vld [vmem:[%s357_s1 + $0x18] sm:$0xff] }
   0x2   :  { %84 = vperm.xlu0 %232, %v23_v0   ;;  %56 = vperm.xlu1 %231, %v23_v0  }
   0x3   :  { %11 = vsyncpa [#allocation4], 0  ;;  %v25_v5 = vld [vmem:[%s357_s1 + $0x10] sm:$0xff]  ;;  %v269_v6 = vmov 3   ;;  %v270_v7 = vmov 0   ;;  %v140_v8 = vld [vmem:[%s358_s2 + $0x8] sm:$0xff]  ;;  %v47_v25 = vlaneseq }
   0x4   :  { %v171_v9 = vld [vmem:[%s359_s3] sm:$0xff]  ;;  %v173_v10 = vld [vmem:[%s359_s3 + $0x10] sm:$0xff]  ;;  %v142_v13 = vld [vmem:[%s358_s2 + $0x18] sm:$0xff]  ;;  %s271_s17 = smov [#allocation3]  }
   0x5   :  { %v139_v11 = vld [vmem:[%s358_s2] sm:$0xff]  ;;  %v141_v12 = vld [vmem:[%s358_s2 + $0x10] sm:$0xff]  ;;  %v172_v14 = vld [vmem:[%s359_s3 + $0x8] sm:$0xff]  ;;  %v48_v28 = vshrl.u32 %v47_v25, 7  ;;  %s218_s18 = sshll.u32 %s271_s17, 4  ;;  %s219_s18 = int_to_ptr.vmem [resolvable:$true] %s218_s18 }
   0x6   :  { %235 = vset.pattern.permute.xlu0 %v268_v2  ;;  %60 = vperm.xlu1 %231, %v24_v3   ;;  %v174_v15 = vld [vmem:[%s359_s3 + $0x18] sm:$0xff]  ;;  %v22_v33 = vld [vmem:[%s356_s0] sm:$0xf]  ;;  %s243_s19 = scalar_lea.vmem %s219_s18, 16  ;;  %s247_s20 = scalar_lea.vmem %s219_s18, 32 }
   0x7   :  { %68 = vperm.xlu0 %235, %v26_v4   ;;  %v49_v29 = vsub.s32 0, %v48_v28  ;;  %v73_v32 = vsub.s32 1, %v48_v28  ;;  %v101_v34 = vsub.s32 2, %v48_v28  ;;  %v129_v36 = vsub.s32 3, %v48_v28  ;;  %p244_p0 = scmp.ne.s32.totalorder %s219_s18, %s243_s19  ;;  %p248_p1 = scmp.lt.s32.totalorder %s219_s18, %s219_s18 }
   0x8   :  { %p249_p2 = scmp.lt.s32.totalorder %s247_s20, %s243_s19 }
   0x9   :  { %v50_v35 = vrot.slane %v22_v33, %v49_v29  ;;  %v74_v38 = vrot.slane %v22_v33, %v73_v32  ;;  %v102_v41 = vrot.slane %v22_v33, %v101_v34  ;;  %v130_v44 = vrot.slane %v22_v33, %v129_v36 }
   0xa   :  { %64 = vperm.xlu1 %231, %v25_v5   ;;  %p250_p3 = por %p249_p2, %p248_p1 }
   0xb   :  { %238 = vset.pattern.permute.xlu0 %v269_v6 }
   0xc   :  { %116 = vperm.xlu0 %238, %v24_v3   ;;  %p251_p4 = pnand %p250_p3, %p244_p0 }
   0xe   :  { %233 = vset.pattern.permute.xlu1 %v267_v1 }
   0xf   :  { %88 = vperm.xlu1 %233, %v24_v3  }
  0x10   :  { %124 = vperm.xlu0 %238, %v26_v4  }
  0x13   :  { %234 = vset.pattern.permute.xlu1 %v270_v7 }
  0x14   :  { %241 = vset.pattern.permute.xlu0 %v270_v7  ;;  %44 = vperm.xlu1 %234, %v26_v4  }
  0x15   :  { %29 = vperm.xlu0 %241, %v23_v0  }
  0x18   :  { %236 = vset.pattern.permute.xlu1 %v267_v1 }
  0x19   :  { %34 = vperm.xlu0 %241, %v24_v3   ;;  %92 = vperm.xlu1 %236, %v25_v5  }
  0x1d   :  { %39 = vperm.xlu0 %241, %v25_v5   ;;  %237 = vset.pattern.permute.xlu1 %v269_v6 }
  0x1e   :  { %112 = vperm.xlu1 %237, %v23_v0  }
  0x21   :  { %150 = vperm.xlu0 %241, %v140_v8  }
  0x22   :  { %239 = vset.pattern.permute.xlu1 %v267_v1 }
  0x23   :  { %96 = vperm.xlu1 %239, %v26_v4  }
  0x25   :  { %177 = vperm.xlu0 %241, %v171_v9  }
  0x27   :  { %240 = vset.pattern.permute.xlu1 %v269_v6 }
  0x28   :  { %120 = vperm.xlu1 %240, %v25_v5  }
  0x29   :  { %187 = vperm.xlu0 %241, %v173_v10  }
  0x2c   :  { %242 = vset.pattern.permute.xlu1 %v270_v7 }
  0x2d   :  { %145 = vperm.xlu1 %242, %v139_v11  }
  0x31   :  { %155 = vperm.xlu1 %242, %v141_v12  }
  0x35   :  { %160 = vperm.xlu1 %242, %v142_v13  }
  0x39   :  { %182 = vperm.xlu1 %242, %v172_v14  }
  0x3d   :  { %192 = vperm.xlu1 %242, %v174_v15  }
  0x81   :  { %v57_v16 = vpop.permute.xlu1 %56  ;;  %v85_v17 = vpop.permute.xlu0 %84 }
  0x82   :  { %v75_v45 = vmul.f32 %v74_v38, %v57_v16  ;;  %v103_v52 = vmul.f32 %v102_v41, %v85_v17 }
  0x85   :  { %v61_v18 = vpop.permute.xlu1 %60 }
  0x86   :  { %v69_v19 = vpop.permute.xlu0 %68  ;;  %v76_v42 = vmul.f32 %v74_v38, %v61_v18 }
  0x87   :  { %v78_v53 = vmul.f32 %v74_v38, %v69_v19 }
  0x89   :  { %v65_v20 = vpop.permute.xlu1 %64 }
  0x8a   :  { %v77_v49 = vmul.f32 %v74_v38, %v65_v20 }
  0x8b   :  { %v117_v21 = vpop.permute.xlu0 %116 }
  0x8c   :  { %v132_v54 = vmul.f32 %v130_v44, %v117_v21 }
  0x8e   :  { %v89_v22 = vpop.permute.xlu1 %88 }
  0x8f   :  { %v125_v23 = vpop.permute.xlu0 %124  ;;  %v104_v50 = vmul.f32 %v102_v41, %v89_v22 }
  0x90   :  { %v134_v9 = vmul.f32 %v130_v44, %v125_v23 }
  0x93   :  { %v45_v24 = vpop.permute.xlu1 %44 }
  0x94   :  { %v30_v26 = vpop.permute.xlu0 %29  ;;  %v54_v55 = vmul.f32 %v50_v35, %v45_v24 }
  0x95   :  { %v51_v43 = vmul.f32 %v50_v35, %v30_v26 }
  0x96   :  { %v82_v1 = vadd.f32 %v78_v53, %v54_v55 }
  0x97   :  { %v79_v51 = vadd.f32 %v75_v45, %v51_v43 }
  0x98   :  { %v93_v27 = vpop.permute.xlu1 %92  ;;  %v35_v31 = vpop.permute.xlu0 %34 }
  0x99   :  { %v52_v39 = vmul.f32 %v50_v35, %v35_v31  ;;  %v105_v60 = vmul.f32 %v102_v41, %v93_v27  ;;  %v107_v63 = vadd.f32 %v103_v52, %v79_v51 }
  0x9b   :  { %v80_v46 = vadd.f32 %v76_v42, %v52_v39 }
  0x9c   :  { %v40_v40 = vpop.permute.xlu0 %39 }
  0x9d   :  { %v113_v30 = vpop.permute.xlu1 %112  ;;  %v53_v47 = vmul.f32 %v50_v35, %v40_v40  ;;  %v108_v58 = vadd.f32 %v104_v50, %v80_v46  ;;  %v209_v35 = vstv %s360_s4 }
  0x9e   :  { %v131_v57 = vmul.f32 %v130_v44, %v113_v30 }
  0x9f   :  { %v81_v56 = vadd.f32 %v77_v49, %v53_v47  ;;  %v136_v2 = vadd.f32 %v132_v54, %v108_v58 }
  0xa0   :  { %v151_v0 = vpop.permute.xlu0 %150  ;;  %v135_v3 = vadd.f32 %v131_v57, %v107_v63 }
  0xa1   :  { %v109_v4 = vadd.f32 %v105_v60, %v81_v56  ;;  %v164_v10 = vadd.f32 %v151_v0, %v136_v2 }
  0xa2   :  { %v97_v37 = vpop.permute.xlu1 %96 }
  0xa3   :  { %v106_v61 = vmul.f32 %v102_v41, %v97_v37  ;;  %v168_v16 = vmax.f32 %v164_v10, 0.0 }
  0xa4   :  { %v178_v12 = vpop.permute.xlu0 %177 }
  0xa5   :  { %v110_v6 = vadd.f32 %v106_v61, %v82_v1 }
  0xa7   :  { %v121_v48 = vpop.permute.xlu1 %120  ;;  %v138_v15 = vadd.f32 %v134_v9, %v110_v6 }
  0xa8   :  { %v133_v62 = vmul.f32 %v130_v44, %v121_v48  ;;  %v188_v22 = vpop.permute.xlu0 %187 }
  0xaa   :  { %v137_v8 = vadd.f32 %v133_v62, %v109_v4 }
  0xac   :  { %v146_v59 = vpop.permute.xlu1 %145 }
  0xad   :  { %v163_v7 = vadd.f32 %v146_v59, %v135_v3 }
  0xaf   :  { %v167_v14 = vmax.f32 %v163_v7, 0.0 }
  0xb0   :  { %v156_v5 = vpop.permute.xlu1 %155 }
  0xb1   :  { %v165_v11 = vadd.f32 %v156_v5, %v137_v8  ;;  %v195_v20 = vmul.f32 %v178_v12, %v167_v14 }
  0xb3   :  { %v169_v17 = vmax.f32 %v165_v11, 0.0 }
  0xb4   :  { %v161_v13 = vpop.permute.xlu1 %160 }
  0xb5   :  { %v166_v18 = vadd.f32 %v161_v13, %v138_v15  ;;  %v197_v24 = vmul.f32 %v188_v22, %v169_v17 }
  0xb7   :  { %v170_v25 = vmax.f32 %v166_v18, 0.0 }
  0xb8   :  { %v183_v19 = vpop.permute.xlu1 %182 }
  0xb9   :  { %v196_v21 = vmul.f32 %v183_v19, %v168_v16 }
  0xbb   :  { %v199_v26 = vadd.f32 %v196_v21, %v195_v20 }
  0xbc   :  { %v193_v27 = vpop.permute.xlu1 %192 }
  0xbd   :  { %v198_v28 = vmul.f32 %v193_v27, %v170_v25  ;;  %v200_v29 = vadd.f32 %v199_v26, %v197_v24 }
  0xbf   :  { %v201_v23 = vadd.f32 %v200_v29, %v198_v28 }
  0xc1   :  { %v202_v30 = vrot.slane %v201_v23, 4 }
  0xc3   :  { %v203_v31 = vadd.f32 %v202_v30, %v201_v23 }
  0xc5   :  { %v204_v32 = vrot.slane %v203_v31, 2 }
  0xc7   :  { %v205_v33 = vadd.f32 %v204_v32, %v203_v31 }
  0xc9   :  { %v206_v34 = vrot.slane %v205_v33, 1 }
  0xcb   :  { %v207_v36 = vadd.f32 %v206_v34, %v205_v33 }
  0xcd   :  { %v210_v37 = vadd.f32 %v209_v35, %v207_v36 }
  0xcf   :  { %211 = vst [vmem:[#allocation3] sm:$0x1] %v210_v37 }
  0xd0   :  { %254 = shalt.err (!%p251_p4)
}
  0xd1   :  { %s255_s23 = scalar_lea.hbm %s361_s5, 16 }
  0xd2   :  { %p256_p5 = scmp.ne.s32.totalorder %s361_s5, %s255_s23  ;;  %p259_p6 = scmp.lt.u32.totalorder %s255_s23, %s361_s5 }
  0xd4   :  { %p261_p7 = pnand %p259_p6, %p256_p5 }
  0xd6   :  { %264 = shalt.err (!%p261_p7)
}
  0xd7   :  { %221 = dma.vmem_to_hbm [thread:$0]  %s219_s18, 16, %s361_s5, [#allocation4]  }
  0xd8   :  { %265 = dma.done.wait [#allocation4], 16  }
  0xd9   :  { %266 = vsyncadd [#allocation4], 4294967280 }
  0xda   :  { %225 = vsyncpa [#allocation4], 1 }

</bundles_post_ra>
